<compile_context>
chip_gen: v7x
topology: tpu7x:2x2x1
jax: 0.10.0
libtpu: 0.0.40
codegen_flags: <defaults>
</compile_context>

<pallas_src>
import functools
import math

import jax
import jax.numpy as jnp
from jax.experimental import pallas as pl
from jax.experimental.pallas import tpu as pltpu


def _round_up(x, m):
    return ((x + m - 1) // m) * m


def _vmem_limit_bytes():
    """Generation-aware scoped-VMEM limit (conservative on v7x's 64 MiB)."""
    cap = None
    try:
        info = pltpu.get_tpu_info()
        cap = getattr(info, "vmem_capacity_bytes", None)
    except Exception:
        cap = None
    if not cap:
        cap = 64 * 1024 * 1024
    return int(min(64 * 1024 * 1024, max(16 * 1024 * 1024, cap // 2)))


def _choose_tokens_per_block(n_tokens, t_max):
    """Pick tokens-per-block T and padded token count N_pad.

    Preference order:
      1. single block == full array (always a legal block shape, no padding),
      2. a multiple of 8 that divides N (no tail padding, no post-slice copy),
      3. pad N up to a multiple of T (rare fallback).
    """
    t_max = max(1, int(t_max))
    if n_tokens <= t_max:
        return n_tokens, n_tokens
    t_max8 = max(8, (t_max // 8) * 8)
    if n_tokens % 8 == 0:
        for t in range(t_max8, 7, -8):
            if n_tokens % t == 0:
                return t, n_tokens
    return t_max8, _round_up(n_tokens, t_max8)


# ----------------------------------------------------------------------------
# Fast path: table resident in VMEM, one-hot MXU gather.
# ----------------------------------------------------------------------------
def _embedding_onehot_kernel(ids_ref, table_ref, out_ref, *, scale, vocab):
    """ids_ref: (T, 1) int32 VMEM; table_ref: (V, D) VMEM; out_ref: (T, D)."""
    ids = ids_ref[...]                                            # (T, 1)
    t = ids.shape[0]
    iota = jax.lax.broadcasted_iota(jnp.int32, (t, vocab), 1)     # (T, V)
    onehot = (iota == ids).astype(table_ref.dtype)                # exact 0/1
    emb = jnp.dot(
        onehot,
        table_ref[...],
        preferred_element_type=jnp.float32,
        precision=jax.lax.Precision.HIGHEST,                      # exact rows
    )
    out_ref[...] = (emb * scale).astype(out_ref.dtype)


# ----------------------------------------------------------------------------
# HBM path: manual per-row gather DMAs, double-buffered across grid steps.
# ----------------------------------------------------------------------------
def _embedding_hbm_kernel(ids_ref, table_hbm, out_ref, row_buf, sem,
                          *, scale, tokens_per_block, unroll):
    """ids_ref: SMEM int32 [N_pad] (scalar prefetch); table_hbm: HBM [V, D];
    out_ref: VMEM [T, D]; row_buf: VMEM [2, T, D]; sem: DMA sem [2]."""
    T = tokens_per_block
    i = pl.program_id(0)
    n = pl.num_programs(0)

    def issue_block(block, slot):
        base = block * T

        def body(t, carry):
            row = ids_ref[base + t]
            pltpu.make_async_copy(
                table_hbm.at[pl.ds(row, 1), :],
                row_buf.at[slot, pl.ds(t, 1), :],
                sem.at[slot],
            ).start()
            return carry

        # Partial unroll lets SMEM id loads / address math / descriptor pushes
        # co-issue instead of serializing on the scalar + misc slots.
        jax.lax.fori_loop(0, T, body, 0, unroll=unroll)

    # Prime the pipeline: block 0 into slot 0 on the first step.
    @pl.when(i == 0)
    def _():
        issue_block(0, 0)

    # Prefetch next block's rows into the other slot (hides gather latency
    # behind this step's wait + scale + output writeback).
    @pl.when(i + 1 < n)
    def _():
        issue_block(i + 1, (i + 1) % 2)

    slot = i % 2
    # Single collapsed wait: the descriptor spans the whole (T, D) slab, whose
    # byte count equals the sum of the T per-row copies signaled on sem[slot].
    pltpu.make_async_copy(
        table_hbm.at[pl.ds(0, T), :],
        row_buf.at[slot],
        sem.at[slot],
    ).wait()

    out_ref[...] = (row_buf[slot].astype(jnp.float32) * scale).astype(out_ref.dtype)


# ----------------------------------------------------------------------------
# Wrapper
# ----------------------------------------------------------------------------
def embeddings_forward(token_ids, table, *, block_tokens=None,
                       use_vmem_table=None):
    """token_ids: int [...]; table: [vocab, D] -> [..., D] in table.dtype."""
    lead_shape = token_ids.shape
    V, D = table.shape
    N = int(math.prod(lead_shape))
    scale = math.sqrt(D)
    itemsize = jnp.dtype(table.dtype).itemsize

    if V > jnp.iinfo(jnp.int32).max:
        raise ValueError("vocab_size must fit in int32 for this kernel")

    # Clamp defensively so data-dependent reads can never go out of bounds.
    flat_ids = jnp.clip(token_ids.reshape(N).astype(jnp.int32), 0, V - 1)

    vmem_limit = _vmem_limit_bytes()
    table_bytes = V * D * itemsize

    if use_vmem_table is None:
        # Small-table fast path: table comfortably VMEM-resident and V small
        # enough that the one-hot (T, V) operand stays cheap on the MXU.
        use_vmem_table = (V <= 4096) and (table_bytes <= (8 << 20))
    if V < 8:
        use_vmem_table = True  # HBM path's collapsed-wait source needs V >= 8

    if use_vmem_table:
        # Cap T so the (T, V) one-hot intermediate stays ~<= 2 MiB.
        onehot_cap = max(8, (2 << 20) // (4 * V))
        t_max = min(block_tokens or 256, onehot_cap)
        T, N_pad = _choose_tokens_per_block(N, t_max)

        ids = flat_ids
        if N_pad != N:
            ids = jnp.pad(ids, (0, N_pad - N))  # pad with valid id 0
        ids = ids.reshape(N_pad, 1)

        grid = (N_pad // T,)
        out_flat = pl.pallas_call(
            functools.partial(_embedding_onehot_kernel, scale=scale, vocab=V),
            grid=grid,
            in_specs=[
                pl.BlockSpec((T, 1), lambda i: (i, 0)),        # ids block
                pl.BlockSpec((V, D), lambda i: (0, 0)),        # resident table
            ],
            out_specs=pl.BlockSpec((T, D), lambda i: (i, 0)),
            out_shape=jax.ShapeDtypeStruct((N_pad, D), table.dtype),
            compiler_params=pltpu.CompilerParams(
                dimension_semantics=("parallel",),             # v7x 2-TC shard
                vmem_limit_bytes=vmem_limit,
            ),
        )(ids, table)
    else:
        # VMEM budget: 2 gather buffers (double-buffer) + 2 output buffers.
        budget_t = max(8, (vmem_limit // 2) // (4 * D * itemsize))
        t_max = min(block_tokens or 512, budget_t, (V // 8) * 8)
        T, N_pad = _choose_tokens_per_block(N, t_max)

        ids = flat_ids
        if N_pad != N:
            ids = jnp.pad(ids, (0, N_pad - N))

        grid = (N_pad // T,)
        unroll = int(min(8, T))

        # NOTE: the full id vector is scalar-prefetched (SMEM) because step i
        # must see block i+1's ids to prefetch its rows.  SMEM cost is
        # next_pow2(4 * N_pad) bytes -- fine up to ~100K tokens per call.
        grid_spec = pltpu.PrefetchScalarGridSpec(
            num_scalar_prefetch=1,
            grid=grid,
            in_specs=[pl.BlockSpec(memory_space=pl.ANY)],       # table in HBM
            out_specs=pl.BlockSpec((T, D), lambda i, ids: (i, 0)),
            scratch_shapes=[
                pltpu.VMEM((2, T, D), table.dtype),             # double buffer
                pltpu.SemaphoreType.DMA((2,)),
            ],
        )
        out_flat = pl.pallas_call(
            functools.partial(_embedding_hbm_kernel, scale=scale,
                              tokens_per_block=T, unroll=unroll),
            grid_spec=grid_spec,
            out_shape=jax.ShapeDtypeStruct((N_pad, D), table.dtype),
            compiler_params=pltpu.CompilerParams(
                # Cross-step prefetch carries state in scratch -> "arbitrary".
                dimension_semantics=("arbitrary",),
                vmem_limit_bytes=vmem_limit,
            ),
        )(ids, table)

    if N_pad != N:
        out_flat = out_flat[:N]
    return out_flat.reshape(*lead_shape, D)


def _reference(token_ids, table):
    V, D = table.shape
    ids = jnp.clip(token_ids.reshape(-1).astype(jnp.int32), 0, V - 1)
    out = jnp.take(table, ids, axis=0) * math.sqrt(D)
    return out.reshape(*token_ids.shape, D)


if __name__ == "__main__":
    key = jax.random.PRNGKey(0)
    k1, k2, k3, k4, k5, k6 = jax.random.split(key, 6)

    # --- Case 1: small module shapes (fast VMEM one-hot path, single block) --
    vocab_size, dim_model = 64, 32
    batch, seq = 2, 8
    table = jax.random.normal(k1, (vocab_size, dim_model), dtype=jnp.float32)
    token_ids = jax.random.randint(k2, (batch, seq), 0, vocab_size,
                                   dtype=jnp.int32)
    out = jax.block_until_ready(embeddings_forward(token_ids, table))
    ref = _reference(token_ids, table)
    assert out.shape == (batch, seq, dim_model), out.shape
    assert jnp.allclose(out, ref, atol=1e-4, rtol=1e-5)

    # --- Case 2: fast path, multi-block grid + tail padding (N=50, T=16) -----
    vocab2, dim2 = 512, 128
    b2, s2 = 2, 25
    table2 = jax.random.normal(k3, (vocab2, dim2), dtype=jnp.float32)
    ids2 = jax.random.randint(k4, (b2, s2), 0, vocab2, dtype=jnp.int32)
    out2 = jax.block_until_ready(
        embeddings_forward(ids2, table2, block_tokens=16))
    ref2 = _reference(ids2, table2)
    assert out2.shape == (b2, s2, dim2), out2.shape
    assert jnp.allclose(out2, ref2, atol=1e-4, rtol=1e-5)

    # --- Case 3: large-vocab HBM gather path (double-buffered manual DMA) ----
    vocab3, dim3 = 2048, 128
    b3, s3 = 2, 64
    table3 = jax.random.normal(k5, (vocab3, dim3), dtype=jnp.float32)
    ids3 = jax.random.randint(k6, (b3, s3), 0, vocab3, dtype=jnp.int32)
    out3 = jax.block_until_ready(
        embeddings_forward(ids3, table3, block_tokens=32, use_vmem_table=False))
    ref3 = _reference(ids3, table3)
    assert out3.shape == (b3, s3, dim3), out3.shape
    assert jnp.allclose(out3, ref3, atol=1e-4, rtol=1e-5)

    print("KERNEL_OK")
</pallas_src>

<mosaic_0001>
module attributes {stable_mosaic.version = 11 : i64} {
  func.func @_embedding_onehot_kernel(%arg0: i32, %arg1: memref<16x1xi32, #tpu.memory_space<vmem>>, %arg2: memref<64x32xf32, #tpu.memory_space<vmem>>, %arg3: memref<16x32xf32, #tpu.memory_space<vmem>>) attributes {dimension_semantics = [#tpu.dimension_semantics<parallel>], iteration_bounds = array<i64: 1>, scalar_prefetch = 0 : i64, scratch_operands = 0 : i64, tpu.core_type = #tpu.core_type<tc>, window_params = [{transform_indices = @transform_0, window_bounds = array<i64: 16, 1>}, {pipeline_mode = #tpu.pipeline_mode<synchronous>, transform_indices = @transform_1, window_bounds = array<i64: 64, 32>}, {transform_indices = @transform_2, window_bounds = array<i64: 16, 32>}]} {
    %c0 = arith.constant 0 : index
    %c0_0 = arith.constant 0 : index
    %0 = vector.load %arg1[%c0, %c0_0] : memref<16x1xi32, #tpu.memory_space<vmem>>, vector<16x1xi32>
    %1 = tpu.iota {dimensions = array<i32: 1>} : vector<16x64xi32>
    %2 = vector.broadcast %0 : vector<16x1xi32> to vector<16x64xi32>
    %3 = arith.cmpi eq, %1, %2 : vector<16x64xi32>
    %4 = arith.extui %3 : vector<16x64xi1> to vector<16x64xi32>
    %5 = arith.sitofp %4 : vector<16x64xi32> to vector<16x64xf32>
    %c0_1 = arith.constant 0 : index
    %c0_2 = arith.constant 0 : index
    %6 = vector.load %arg2[%c0_1, %c0_2] : memref<64x32xf32, #tpu.memory_space<vmem>>, vector<64x32xf32>
    %cst = arith.constant dense<0.000000e+00> : vector<16x32xf32>
    %7 = tpu.matmul %5, %6, %cst {dimension_numbers = #tpu.dot_dimension_numbers<[1], [0], [0], [1], [0, 0, 1, 1], [], []>, precision = #tpu.contract_precision<fp32>} : vector<16x64xf32>, vector<64x32xf32>, vector<16x32xf32> -> vector<16x32xf32>
    %cst_3 = arith.constant 5.65685415 : f32
    %8 = vector.broadcast %cst_3 : f32 to vector<16x32xf32>
    %9 = arith.mulf %7, %8 : vector<16x32xf32>
    %c0_4 = arith.constant 0 : index
    %c0_5 = arith.constant 0 : index
    %10 = vector.load %arg3[%c0_4, %c0_5] : memref<16x32xf32, #tpu.memory_space<vmem>>, vector<16x32xf32>
    tpu.vector_store %arg3[%c0_4, %c0_5], %9 {strides = array<i32>} : memref<16x32xf32, #tpu.memory_space<vmem>>, vector<16x32xf32>,
    return
  }
  func.func @transform_0(%arg0: i32) -> (i32, i32) {
    %c0_i32 = arith.constant 0 : i32
    %c0_i32_0 = arith.constant 0 : i32
    return %arg0, %c0_i32 : i32, i32
  }
  func.func @transform_1(%arg0: i32) -> (i32, i32) {
    %c0_i32 = arith.constant 0 : i32
    %c0_i32_0 = arith.constant 0 : i32
    %c0_i32_1 = arith.constant 0 : i32
    return %c0_i32, %c0_i32_0 : i32, i32
  }
  func.func @transform_2(%arg0: i32) -> (i32, i32) {
    %c0_i32 = arith.constant 0 : i32
    %c0_i32_0 = arith.constant 0 : i32
    return %arg0, %c0_i32 : i32, i32
  }
}

</mosaic_0001>

<bundles_post_ra>
// kernel: tpu_custom_call.1
= control target key start
LH: loop header
LB: loop body
LE: loop exit
PB: predicated region body
PF: predicated region fallthrough
CT: control target
= control target key end

     0   :  { %v962_v2 = vmov 0   ;;  %s1068_s0 = inlined_call_operand.vmem [shape: s32[16,1], index: 0, kind: input, shape index: {}]   ;;  %s1069_s1 = inlined_call_operand.vmem [shape: f32[64,32], index: 1, kind: input, shape index: {}]   ;;  %s1070_s2 = inlined_call_operand.hbm [shape: f32[16,32], index: 2, kind: output, shape index: {}]  }
   0x1   :  { %v12_v0 = vld [vmem:[%s1068_s0] sm:$0xff]  ;;  %937 = vset.pattern.permute.xlu0 %v962_v2  ;;  %v29_v3 = vld [vmem:[%s1069_s1 + $0x8] sm:$0xff]  ;;  %v30_v5 = vld [vmem:[%s1069_s1 + $0x10] sm:$0xff] }
   0x2   :  { %v28_v1 = vld [vmem:[%s1069_s1] sm:$0xff]  ;;  %v31_v6 = vld [vmem:[%s1069_s1 + $0x18] sm:$0xff]  ;;  %17 = vperm.xlu0 %937, %v12_v0   ;;  %v47_v7 = vand.u32 4294901760, %v29_v3  ;;  %v50_v8 = vand.u32 4294901760, %v30_v5  ;;  %v33_v11 = vld [vmem:[%s1069_s1 + $0x28] sm:$0xff] }
   0x3   :  { %v44_v4 = vand.u32 4294901760, %v28_v1  ;;  %v53_v9 = vand.u32 4294901760, %v31_v6  ;;  %v32_v10 = vld [vmem:[%s1069_s1 + $0x20] sm:$0xff]  ;;  %v13_v12 = vld [vmem:[%s1068_s0 + $0x8] sm:$0xff] }
   0x4   :  { %7 = vsyncpa [#allocation3], 0  ;;  %v56_v15 = vand.u32 4294901760, %v32_v10  ;;  %v59_v16 = vand.u32 4294901760, %v33_v11  ;;  %v34_v17 = vld [vmem:[%s1069_s1 + $0x30] sm:$0xff]  ;;  %v35_v18 = vld [vmem:[%s1069_s1 + $0x38] sm:$0xff]  ;;  %v145_v20 = vsub.f32 %v29_v3, %v47_v7  ;;  %v152_v28 = vsub.f32 %v30_v5, %v50_v8 }
   0x5   :  { %v1006_v13 = vpack.c.bf16 %v47_v7, %v44_v4  ;;  %v1008_v14 = vpack.c.bf16 %v53_v9, %v50_v8  ;;  %v138_v19 = vsub.f32 %v28_v1, %v44_v4  ;;  %v62_v21 = vand.u32 4294901760, %v34_v17  ;;  %s964_s0 = smov [#allocation2]  }
   0x6   :  { %20 = vperm.xlu0 %937, %v13_v12   ;;  %v1021_v22 = vpack.c.bf16 %v59_v16, %v56_v15  ;;  %v65_v23 = vand.u32 4294901760, %v35_v18  ;;  %v146_v25 = vand.u32 4294901760, %v145_v20  ;;  %v159_v29 = vsub.f32 %v31_v6, %v53_v9  ;;  %s633_s1 = sshll.u32 %s964_s0, 4  ;;  %s634_s1 = int_to_ptr.vmem [resolvable:$true] %s633_s1 }
   0x7   :  { %875 = vmatprep.subr.bf16.mxu0 %v1006_v13  ;;  %827 = vmatprep.subr.bf16.mxu1 %v1006_v13  ;;  %v139_v24 = vand.u32 4294901760, %v138_v19  ;;  %v153_v33 = vand.u32 4294901760, %v152_v28  ;;  %v166_v39 = vsub.f32 %v32_v10, %v56_v15  ;;  %v173_v40 = vsub.f32 %v33_v11, %v59_v16  ;;  %s938_s29 = scalar_lea.vmem %s634_s1, 256  ;;  %p943_p1 = scmp.lt.s32.totalorder %s634_s1, %s634_s1 }
   0x8   :  { %877 = vmatpush3.bf16.msra.mxu0 %v1006_v13  ;;  %829 = vmatpush3.bf16.msra.mxu1 %v1006_v13  ;;  %v147_v27 = vsub.f32 %v145_v20, %v146_v25  ;;  %v1027_v30 = vpack.c.bf16 %v65_v23, %v62_v21  ;;  %v160_v34 = vand.u32 4294901760, %v159_v29  ;;  %v180_v47 = vsub.f32 %v34_v17, %v62_v21  ;;  %p939_p0 = scmp.ne.s32.totalorder %s634_s1, %s938_s29  ;;  %p944_p2 = scmp.lt.s32.totalorder %s938_s29, %s938_s29 }
   0x9   :  { %879 = vmatprep.subr.bf16.mxu0 %v1008_v14  ;;  %831 = vmatprep.subr.bf16.mxu1 %v1008_v14  ;;  %v140_v26 = vsub.f32 %v138_v19, %v139_v24  ;;  %v154_v36 = vsub.f32 %v152_v28, %v153_v33  ;;  %v890_v38 = vpack.c.bf16 %v146_v25, %v139_v24  ;;  %v167_v44 = vand.u32 4294901760, %v166_v39 }
   0xa   :  { %v148_v32 = vand.u32 4294901760, %v147_v27  ;;  %v1031_v35 = vpack.c.bf16 %v160_v34, %v153_v33  ;;  %v161_v37 = vsub.f32 %v159_v29, %v160_v34  ;;  %v174_v45 = vand.u32 4294901760, %v173_v40  ;;  %p945_p3 = por %p944_p2, %p943_p1 }
   0xb   :  { %v141_v31 = vand.u32 4294901760, %v140_v26  ;;  %v155_v42 = vand.u32 4294901760, %v154_v36  ;;  %v187_v48 = vsub.f32 %v35_v18, %v65_v23  ;;  %v168_v50 = vsub.f32 %v166_v39, %v167_v44 }
   0xc   :  { %881 = vmatpush3.bf16.msra.mxu0 %v1008_v14  ;;  %833 = vmatpush3.bf16.msra.mxu1 %v1008_v14  ;;  %v162_v43 = vand.u32 4294901760, %v161_v37  ;;  %v898_v49 = vpack.c.bf16 %v174_v45, %v167_v44  ;;  %v175_v51 = vsub.f32 %v173_v40, %v174_v45  ;;  %v181_v52 = vand.u32 4294901760, %v180_v47  ;;  %p946_p4 = pnand %p945_p3, %p939_p0 }
   0xd   :  { %883 = vmatprep.subr.bf16.mxu0 %v1021_v22  ;;  %835 = vmatprep.subr.bf16.mxu1 %v1021_v22  ;;  %v842_v41 = vpack.c.bf16 %v148_v32, %v141_v31  ;;  %v188_v53 = vand.u32 4294901760, %v187_v48  ;;  %v169_v54 = vand.u32 4294901760, %v168_v50  ;;  %v858_v63 = vpack.c.bf16 %v145_v20, %v138_v19 }
   0xe   :  { %v846_v46 = vpack.c.bf16 %v162_v43, %v155_v42  ;;  %v176_v55 = vand.u32 4294901760, %v175_v51  ;;  %v182_v57 = vsub.f32 %v180_v47, %v181_v52  ;;  %v862_v0 = vpack.c.bf16 %v159_v29, %v152_v28 }
   0xf   :  { %v902_v56 = vpack.c.bf16 %v188_v53, %v181_v52  ;;  %v189_v58 = vsub.f32 %v187_v48, %v188_v53  ;;  %v866_v1 = vpack.c.bf16 %v173_v40, %v166_v39  ;;  %v870_v2 = vpack.c.bf16 %v187_v48, %v180_v47 }
  0x10   :  { %885 = vmatpush3.bf16.msra.mxu0 %v1021_v22  ;;  %837 = vmatpush3.bf16.msra.mxu1 %v1021_v22  ;;  %v850_v59 = vpack.c.bf16 %v176_v55, %v169_v54  ;;  %v183_v60 = vand.u32 4294901760, %v182_v57  ;;  %v14_v3 = vlaneseq  ;;  %vm36_vm0 = vcmask 523264  }
  0x11   :  { %887 = vmatprep.subr.bf16.mxu0 %v1027_v30  ;;  %839 = vmatprep.subr.bf16.mxu1 %v1027_v30  ;;  %v190_v61 = vand.u32 4294901760, %v189_v58  ;;  %v963_v6 = vmov 0.0   ;;  %vm625_vm3 = vcmask 261120  }
  0x12   :  { %v15_v4 = vand.u32 127, %v14_v3 }
  0x13   :  { %v854_v62 = vpack.c.bf16 %v190_v61, %v183_v60 }
  0x14   :  { %889 = vmatpush3.bf16.msra.mxu0 %v1027_v30  ;;  %841 = vmatpush3.bf16.msra.mxu1 %v1027_v30 }
  0x15   :  { %891 = vmatprep.subr.bf16.mxu0 %v890_v38  ;;  %843 = vmatprep.subr.bf16.mxu1 %v842_v41 }
  0x81   :  { %v18_v5 = vpop.permute.xlu0 %17 }
  0x82   :  { %vm22_vm1 = vcmp.eq.s32.totalorder %v15_v4, %v18_v5 }
  0x83   :  { %v644_v7 = vsel %vm22_vm1, 1.0, %v963_v6 }
  0x84   :  { %v38_v8 = vsel %vm36_vm0, %v644_v7, 0 }
  0x85   :  { %v117_v9 = vsub.f32 %v38_v8, %v38_v8  ;;  %v21_v10 = vpop.permute.xlu0 %20 }
  0x86   :  { %vm23_vm2 = vcmp.eq.s32.totalorder %v15_v4, %v21_v10 }
  0x87   :  { %v645_v11 = vsel %vm23_vm2, 1.0, %v963_v6  ;;  %v118_v12 = vand.u32 4294901760, %v117_v9 }
  0x88   :  { %v41_v15 = vsel %vm36_vm0, %v645_v11, 0 }
  0x89   :  { %v127_v16 = vsub.f32 %v41_v15, %v41_v15  ;;  %785 = vmatprep.mubr.f32.mxu0 %v118_v12  ;;  %v119_v17 = vsub.f32 %v117_v9, %v118_v12 }
  0x8b   :  { %v120_v18 = vand.u32 4294901760, %v119_v17  ;;  %v128_v19 = vand.u32 4294901760, %v127_v16 }
  0x8d   :  { %728 = vmatprep.mubr.f32.mxu1 %v120_v18  ;;  %786 = vmatmul.mubr.f32.vlgmr.msra.gmra.mrb[0].mxu0 %v128_v19  ;;  %v129_v20 = vsub.f32 %v127_v16, %v128_v19 }
  0x8e   :  { %893 = vmatpush3.bf16.msra.mxu0 %v890_v38  ;;  %804 = vmatprep.mubr.msk.f32.mxu0 %vm36_vm0, %v644_v7 }
  0x8f   :  { %895 = vmatprep.subr.bf16.mxu0 %v1031_v35  ;;  %v130_v21 = vand.u32 4294901760, %v129_v20 }
  0x91   :  { %729 = vmatmul.mubr.f32.vlgmr.msra.gmra.mrb[0].mxu1 %v130_v21 }
  0x92   :  { %845 = vmatpush3.bf16.msra.mxu1 %v842_v41  ;;  %897 = vmatpush3.bf16.msra.mxu0 %v1031_v35 }
  0x93   :  { %747 = vmatprep.mubr.msk.f32.mxu1 %vm36_vm0, %v644_v7  ;;  %847 = vmatprep.subr.bf16.mxu1 %v846_v46 }
  0x94   :  { %899 = vmatprep.subr.bf16.mxu0 %v898_v49 }
  0x96   :  { %849 = vmatpush3.bf16.msra.mxu1 %v846_v46  ;;  %901 = vmatpush3.bf16.msra.mxu0 %v898_v49 }
  0x97   :  { %851 = vmatprep.subr.bf16.mxu1 %v850_v59  ;;  %903 = vmatprep.subr.bf16.mxu0 %v902_v56 }
  0x9a   :  { %853 = vmatpush3.bf16.msra.mxu1 %v850_v59  ;;  %905 = vmatpush3.bf16.msra.mxu0 %v902_v56 }
  0x9b   :  { %855 = vmatprep.subr.bf16.mxu1 %v854_v62  ;;  %907 = vmatprep.subr.bf16.mxu0 %v1006_v13 }
  0x9d   :  { %805 = vmatmul.mubr.msk.f32.vlgmr.msra.gmra.mrb[0].mxu0 %vm36_vm0, %v645_v11 }
  0x9e   :  { %857 = vmatpush3.bf16.msra.mxu1 %v854_v62  ;;  %909 = vmatpush3.bf16.msra.mxu0 %v1006_v13 }
  0x9f   :  { %823 = vmatprep.mubr.msk.f32.mxu0 %vm36_vm0, %v644_v7  ;;  %859 = vmatprep.subr.bf16.mxu1 %v858_v63 }
  0xa0   :  { %911 = vmatprep.subr.bf16.mxu0 %v1008_v14 }
  0xa1   :  { %748 = vmatmul.mubr.msk.f32.vlgmr.msra.gmra.mrb[0].mxu1 %vm36_vm0, %v645_v11 }
  0xa2   :  { %861 = vmatpush3.bf16.msra.mxu1 %v858_v63  ;;  %766 = vmatprep.mubr.f32.mxu1 %v117_v9 }
  0xa3   :  { %913 = vmatpush3.bf16.msra.mxu0 %v1008_v14  ;;  %863 = vmatprep.subr.bf16.mxu1 %v862_v0 }
  0xa4   :  { %915 = vmatprep.subr.bf16.mxu0 %v1021_v22 }
  0xa6   :  { %865 = vmatpush3.bf16.msra.mxu1 %v862_v0 }
  0xa7   :  { %917 = vmatpush3.bf16.msra.mxu0 %v1021_v22  ;;  %867 = vmatprep.subr.bf16.mxu1 %v866_v1 }
  0xa8   :  { %919 = vmatprep.subr.bf16.mxu0 %v1027_v30 }
  0xaa   :  { %869 = vmatpush3.bf16.msra.mxu1 %v866_v1 }
  0xab   :  { %921 = vmatpush3.bf16.msra.mxu0 %v1027_v30  ;;  %871 = vmatprep.subr.bf16.mxu1 %v870_v2 }
  0xae   :  { %824 = vmatmul.mubr.msk.f32.vlgmr.msra.gmra.mrb[0].mxu0 %vm36_vm0, %v645_v11  ;;  %873 = vmatpush3.bf16.msra.mxu1 %v870_v2 }
  0xb1   :  { %767 = vmatmul.mubr.f32.vlgmr.msra.gmra.mrb[0].mxu1 %v127_v16 }
 0x181   :  { %v825_v13 = vpop.f32.mrb[0].mxu0 }
 0x182   :  { %v613_v23 = vpop.f32.mrb[1].mxu0 }
 0x184   :  { %v768_v14 = vpop.f32.mrb[0].mxu1 }
 0x185   :  { %v922_v24 = vadd.f32 %v825_v13, %v768_v14  ;;  %v337_v25 = vpop.f32.mrb[1].mxu1 }
 0x186   :  { %v923_v22 = vadd.f32 %v613_v23, %v337_v25 }
 0x187   :  { %v624_v26 = vmul.f32 5.656854, %v922_v24 }
 0x188   :  { %v623_v27 = vmul.f32 5.656854, %v923_v22 }
 0x189   :  { %627 = vst.msk [vmem:[#allocation2 + $0x8] sm:$0xff] %vm625_vm3, %v624_v26 }
 0x18a   :  { %626 = vst.msk [vmem:[#allocation2] sm:$0xff] %vm625_vm3, %v623_v27 }
 0x18b   :  { %949 = shalt.err (!%p946_p4)
}
 0x18c   :  { %s950_s4 = scalar_lea.hbm %s1070_s2, 256 }
 0x18d   :  { %p951_p5 = scmp.ne.s32.totalorder %s1070_s2, %s950_s4  ;;  %p954_p6 = scmp.lt.u32.totalorder %s950_s4, %s1070_s2 }
 0x18f   :  { %p956_p7 = pnand %p954_p6, %p951_p5 }
 0x191   :  { %959 = shalt.err (!%p956_p7)
}
 0x192   :  { %s965_s9 = smov 128   ;;  %s966_s10 = smov 8  }
 0x193   :  { %639 = dma.vmem_to_hbm [thread:$0]  %s634_s1, 256, %s1070_s2, [#allocation3], %s965_s9, %s965_s9, %s966_s10  }
 0x194   :  { %960 = dma.done.wait [#allocation3], 256  }
 0x195   :  { %961 = vsyncadd [#allocation3], 4294967040 }
 0x196   :  { %643 = vsyncpa [#allocation3], 1 }

</bundles_post_ra>
